<compile_context>
chip_gen: v5e
topology: v5e:2x2
jax: 0.10.0
libtpu: 0.0.40
codegen_flags: <defaults>
</compile_context>

<pallas_src>
import jax
import jax.numpy as jnp
from jax.experimental import pallas as pl
from jax.experimental.pallas import tpu as pltpu


# --------------------------------------------------------------------------- #
# Kernel
# --------------------------------------------------------------------------- #
def _logits_kernel(h_ref, w_ref, o_ref):
    """One (batch tile, vocab tile) of logits.

    h_ref : VMEM [TILE_B, H]       (gathered last-token hidden states)
    w_ref : VMEM [TILE_V, H]       (one vocab tile of the unembedding weight)
    o_ref : VMEM [TILE_B, TILE_V]  (float32 logits tile)
    """
    # (TB, H) @ (TV, H)^T -> (TB, TV); f32 accumulation preserves the
    # `.float()` semantics of the reference.  Contraction on dim 1 of the RHS
    # uses the MXU's transposed-operand path (no per-tile XLU transpose).
    o_ref[...] = jax.lax.dot_general(
        h_ref[...],
        w_ref[...],
        dimension_numbers=(((1,), (1,)), ((), ())),
        preferred_element_type=jnp.float32,
    )


# --------------------------------------------------------------------------- #
# Sizing helpers
# --------------------------------------------------------------------------- #
def _round_up(x, m):
    return ((x + m - 1) // m) * m


def _round_down(x, m):
    return (x // m) * m


def _vmem_capacity_bytes():
    """Physical VMEM of the current chip (per TensorCore); conservative fallback."""
    try:
        cap = getattr(pltpu.get_tpu_info(), "vmem_capacity_bytes", None)
        if cap:
            return int(cap)
    except Exception:
        pass
    return 64 << 20  # v7x per-TC capacity: safe lower bound across generations


def _sublane_granule(dtype):
    """Sublane packing granule: 8 rows for 32-bit, 16 for 16-bit, 32 for 8-bit."""
    nbytes = max(1, jnp.dtype(dtype).itemsize)
    return max(8, 32 // nbytes)


def _pick_tiles(b_pad, hidden, vocab, w_bytes, h_bytes, vmem_cap, max_tile_v):
    """Budget-aware (tile_b, tile_v) for the weight-streaming matmul."""
    budget = int(vmem_cap * 0.85)

    # Batch tile: cap it so the f32 output tile / LHS block don't eat the
    # weight-tile budget at large decode batches.
    tile_b = min(b_pad, 256)

    # VMEM model (default double-buffering on every BlockSpec):
    #   2*tv*H*w_bytes  (weight stream)  +  2*tb*H*h_bytes (LHS block)
    #   + 2*tb*tv*4     (f32 output tile)              <= budget
    rem = budget - 2 * tile_b * hidden * h_bytes
    denom = 2 * hidden * w_bytes + 8 * tile_b
    tile_v = _round_down(max(rem, 0) // denom, 128)
    tile_v = max(128, tile_v)
    tile_v = min(tile_v, max_tile_v, _round_up(vocab, 128))

    # Megacore (v7x has 2 TCs): keep >= ~8 vocab tiles when the vocab is big
    # enough that each tile can still stay >= 512 rows (HBM-roofline-efficient
    # per the measured tile sweep).
    if vocab >= 8 * 512:
        tile_v = min(tile_v, max(512, _round_down(-(-vocab // 8), 128)))

    return tile_b, tile_v


# --------------------------------------------------------------------------- #
# Forward wrapper (== LogitsProcessor.forward, returning next_token_logits)
# --------------------------------------------------------------------------- #
def logits_processor_forward(input_ids, hidden_states, weight,
                             extend_lens=None, mode="extend", max_tile_v=2048):
    del input_ids  # unused in the reference forward as well
    _, H = hidden_states.shape
    V, H2 = weight.shape
    assert H == H2

    # --- gather the [B, H] matmul LHS outside the kernel (tiny gather) ------
    if mode == "decode":
        last_hidden = hidden_states
    else:
        # NOTE: zero-length entries in extend_lens make cumsum-1 point at the
        # previous sequence's last token — identical to the PyTorch reference.
        last_index = (jnp.cumsum(extend_lens.astype(jnp.int32)) - 1).astype(jnp.int32)
        last_hidden = jnp.take(hidden_states, last_index, axis=0)
    B = int(last_hidden.shape[0])

    w_bytes = jnp.dtype(weight.dtype).itemsize
    h_bytes = jnp.dtype(last_hidden.dtype).itemsize

    # Pad batch to the input dtype's sublane granule (unmasked lane-dense vst).
    granule = _sublane_granule(last_hidden.dtype)
    B_pad = max(granule, _round_up(B, granule))

    # --- per-generation tiling & VMEM budget ---------------------------------
    vmem_cap = _vmem_capacity_bytes()
    tile_b, tile_v = _pick_tiles(B_pad, H, V, w_bytes, h_bytes, vmem_cap, max_tile_v)

    n_b = pl.cdiv(B_pad, tile_b)
    n_v = pl.cdiv(V, tile_v)
    B_grid = n_b * tile_b          # batch rows presented to the kernel
    V_grid = n_v * tile_v          # padded vocab cols in the output (sliced off)

    if B_grid != B:
        last_hidden = jnp.pad(last_hidden, ((0, B_grid - B), (0, 0)))

    vmem_need = (2 * tile_v * H * w_bytes        # weight tiles (double buffered)
                 + 2 * tile_b * H * h_bytes      # LHS block
                 + 2 * tile_b * tile_v * 4)      # f32 output tiles
    vmem_limit = int(min(max(vmem_need + (2 << 20), 8 << 20),
                         int(vmem_cap * 0.9)))

    cost = pl.CostEstimate(
        flops=2 * B_grid * V_grid * H,
        transcendentals=0,
        bytes_accessed=int(n_b * V * H * w_bytes
                           + B_grid * H * h_bytes
                           + B_grid * V_grid * 4),
    )

    out = pl.pallas_call(
        _logits_kernel,
        out_shape=jax.ShapeDtypeStruct((B_grid, V_grid), jnp.float32),
        grid_spec=pltpu.PrefetchScalarGridSpec(
            num_scalar_prefetch=0,
            # Vocab innermost: the weight stays the long contiguous HBM stream;
            # the hidden block index is constant across it (no re-DMA).
            grid=(n_b, n_v),
            in_specs=[
                pl.BlockSpec((tile_b, H), lambda i, j: (i, 0)),
                # Partial trailing vocab block (V % tile_v != 0) is handled by
                # Pallas; garbage rows only feed padded output columns.
                pl.BlockSpec((tile_v, H), lambda i, j: (j, 0)),
            ],
            out_specs=pl.BlockSpec((tile_b, tile_v), lambda i, j: (i, j)),
        ),
        compiler_params=pltpu.CompilerParams(
            # Both axes independent -> megacore sharding on v7x.
            dimension_semantics=("parallel", "parallel"),
            vmem_limit_bytes=vmem_limit,
        ),
        cost_estimate=cost,
    )(last_hidden, weight)

    # Strip batch/vocab padding.  (== LogitsProcessorOutput.next_token_logits)
    return out[:B, :V]


# --------------------------------------------------------------------------- #
# Self-test
# --------------------------------------------------------------------------- #
if __name__ == "__main__":
    key = jax.random.PRNGKey(0)
    k_h, k_w, k_ids, k_d, k_w2 = jax.random.split(key, 5)

    # Small shapes consistent with the forward pass:
    #   total prompt tokens T=16, hidden H=256, vocab V=512, batch B=2
    T, H, V = 16, 256, 512
    extend_lens = jnp.array([7, 9], dtype=jnp.int32)  # sums to T

    hidden_states = jax.random.normal(k_h, (T, H), dtype=jnp.float32)
    weight = jax.random.normal(k_w, (V, H), dtype=jnp.float32) * 0.05
    input_ids = jax.random.randint(k_ids, (T,), 0, V, dtype=jnp.int32)

    last_index = jnp.cumsum(extend_lens) - 1
    hi = jax.lax.Precision.HIGHEST  # accurate f32 references

    # --- EXTEND / prefill path ----------------------------------------------
    logits = logits_processor_forward(
        input_ids, hidden_states, weight, extend_lens=extend_lens, mode="extend"
    )
    logits = jax.block_until_ready(logits)
    ref = jnp.matmul(hidden_states[last_index], weight.T, precision=hi)
    assert logits.shape == (2, V) and logits.dtype == jnp.float32
    assert jnp.allclose(logits, ref, atol=5e-3, rtol=5e-3)

    # --- DECODE path (hidden_states already [B, H], no gather) ---------------
    Bd = 4
    decode_hidden = jax.random.normal(k_d, (Bd, H), dtype=jnp.float32)
    dec_logits = jax.block_until_ready(
        logits_processor_forward(None, decode_hidden, weight, mode="decode"))
    dec_ref = jnp.matmul(decode_hidden, weight.T, precision=hi)
    assert dec_logits.shape == (Bd, V) and dec_logits.dtype == jnp.float32
    assert jnp.allclose(dec_logits, dec_ref, atol=5e-3, rtol=5e-3)

    # --- bf16 weight streaming (recommended production config) ---------------
    bf_logits = jax.block_until_ready(logits_processor_forward(
        input_ids, hidden_states.astype(jnp.bfloat16),
        weight.astype(jnp.bfloat16), extend_lens=extend_lens, mode="extend"))
    bf_ref = jnp.matmul(hidden_states[last_index].astype(jnp.bfloat16),
                        weight.astype(jnp.bfloat16).T,
                        preferred_element_type=jnp.float32)
    assert bf_logits.dtype == jnp.float32
    assert jnp.allclose(bf_logits, bf_ref, atol=3e-2, rtol=3e-2)

    # --- non-dividing vocab: cdiv grid with a partial trailing weight block --
    V2 = 384
    weight2 = jax.random.normal(k_w2, (V2, H), dtype=jnp.float32) * 0.05
    part = jax.block_until_ready(logits_processor_forward(
        input_ids, hidden_states, weight2,
        extend_lens=extend_lens, mode="extend", max_tile_v=256))
    part_ref = jnp.matmul(hidden_states[last_index], weight2.T, precision=hi)
    assert part.shape == (2, V2) and part.dtype == jnp.float32
    assert jnp.allclose(part, part_ref, atol=5e-3, rtol=5e-3)

    print("KERNEL_OK")
</pallas_src>

<mosaic_0001>
module attributes {stable_mosaic.version = 11 : i64} {
  func.func @_logits_kernel(%arg0: i32, %arg1: i32, %arg2: memref<8x256xf32, #tpu.memory_space<vmem>>, %arg3: memref<512x256xf32, #tpu.memory_space<vmem>>, %arg4: memref<8x512xf32, #tpu.memory_space<vmem>>) attributes {dimension_semantics = [#tpu.dimension_semantics<parallel>, #tpu.dimension_semantics<parallel>], iteration_bounds = array<i64: 1, 1>, scalar_prefetch = 0 : i64, scratch_operands = 0 : i64, tpu.core_type = #tpu.core_type<tc>, window_params = [{transform_indices = @transform_0, window_bounds = array<i64: 8, 256>}, {transform_indices = @transform_1, window_bounds = array<i64: 512, 256>}, {transform_indices = @transform_2, window_bounds = array<i64: 8, 512>}]} {
    %c0 = arith.constant 0 : index
    %c0_0 = arith.constant 0 : index
    %0 = vector.load %arg2[%c0, %c0_0] : memref<8x256xf32, #tpu.memory_space<vmem>>, vector<8x256xf32>
    %c0_1 = arith.constant 0 : index
    %c0_2 = arith.constant 0 : index
    %1 = vector.load %arg3[%c0_1, %c0_2] : memref<512x256xf32, #tpu.memory_space<vmem>>, vector<512x256xf32>
    %cst = arith.constant dense<0.000000e+00> : vector<8x512xf32>
    %2 = tpu.matmul %0, %1, %cst {dimension_numbers = #tpu.dot_dimension_numbers<[1], [1], [0], [0], [0, 0, 1, 0], [], []>} : vector<8x256xf32>, vector<512x256xf32>, vector<8x512xf32> -> vector<8x512xf32>
    %c0_3 = arith.constant 0 : index
    %c0_4 = arith.constant 0 : index
    %3 = vector.load %arg4[%c0_3, %c0_4] : memref<8x512xf32, #tpu.memory_space<vmem>>, vector<8x512xf32>
    tpu.vector_store %arg4[%c0_3, %c0_4], %2 {strides = array<i32>} : memref<8x512xf32, #tpu.memory_space<vmem>>, vector<8x512xf32>,
    return
  }
  func.func @transform_0(%arg0: i32, %arg1: i32) -> (i32, i32) {
    %c0_i32 = arith.constant 0 : i32
    %c0_i32_0 = arith.constant 0 : i32
    return %arg0, %c0_i32 : i32, i32
  }
  func.func @transform_1(%arg0: i32, %arg1: i32) -> (i32, i32) {
    %c0_i32 = arith.constant 0 : i32
    %c0_i32_0 = arith.constant 0 : i32
    return %arg1, %c0_i32 : i32, i32
  }
  func.func @transform_2(%arg0: i32, %arg1: i32) -> (i32, i32) {
    %c0_i32 = arith.constant 0 : i32
    return %arg0, %arg1 : i32, i32
  }
}

</mosaic_0001>

<bundles_post_ra>
// kernel: tpu_custom_call.1
= control target key start
LH: loop header
LB: loop body
LE: loop exit
PB: predicated region body
PF: predicated region fallthrough
CT: control target
= control target key end

     0   :  { %7 = vsyncpa [#allocation3], 0  ;;  %s478_s0 = inlined_call_operand.hbm [shape: f32[8,256], index: 0, kind: input, shape index: {}]   ;;  %s479_s1 = inlined_call_operand.hbm [shape: f32[512,256], index: 1, kind: input, shape index: {}]   ;;  %s480_s2 = inlined_call_operand.hbm [shape: f32[8,512], index: 2, kind: output, shape index: {}]  }
   0x1   :  { %8 = vsyncpa [#allocation6], 0 }
   0x2   :  { %9 = vsyncpa [#allocation4], 0  ;;  %s15_s11 = sshll.u32 %s478_s0, 4  ;;  %s437_s12 = smov [#allocation2]   ;;  %s16_s11 = int_to_ptr.hbm [resolvable:$true] %s15_s11 }
   0x3   :  { %s17_s13 = sshll.u32 %s437_s12, 4  ;;  %s25_s16 = sshll.u32 %s479_s1, 4  ;;  %s18_s13 = int_to_ptr.vmem [resolvable:$true] %s17_s13  ;;  %s26_s16 = int_to_ptr.hbm [resolvable:$true] %s25_s16 }
   0x4   :  { %20 = dma.hbm_to_vmem [thread:$0]  %s16_s11, 256, %s18_s13, [#allocation3]  }
   0x5   :  { %s438_s17 = smov [#allocation5]   ;;  %s439_s19 = smov 256  }
   0x6   :  { %s27_s18 = sshll.u32 %s438_s17, 4  ;;  %s440_s20 = smov 16   ;;  %s28_s18 = int_to_ptr.vmem [resolvable:$true] %s27_s18 }
   0x7   :  { %33 = dma.hbm_to_vmem [thread:$0]  %s26_s16, 16384, %s28_s18, [#allocation6], %s439_s19, %s439_s19, %s440_s20  }
   0x8   :  { %431 = dma.done.wait [#allocation3], 256  }
   0x9   :  { %432 = vsyncadd [#allocation3], 4294967040 }
   0xa   :  { %433 = dma.done.wait [#allocation6], 16384  }
   0xb   :  { %434 = vsyncadd [#allocation6], 4294950912  ;;  %v106_v0 = vld [vmem:[#allocation5 + $0x1f0] sm:$0xff]  ;;  %v107_v1 = vld [vmem:[#allocation5 + $0x1f8] sm:$0xff]  ;;  %s441_s0 = smov [#allocation7]   ;;  %s343_s23 = sshll.u32 %s480_s2, 4  ;;  %s344_s23 = int_to_ptr.hbm [resolvable:$true] %s343_s23 }
   0xc   :  { %212 = vmatpush.xpose.msra.mxu2 %v106_v0  ;;  %232 = vmatpush.xpose.msra.mxu3 %v107_v1  ;;  %v74_v2 = vld [vmem:[#allocation5 + $0xf0] sm:$0xff]  ;;  %v75_v3 = vld [vmem:[#allocation5 + $0xf8] sm:$0xff]  ;;  %v104_v4 = vld [vmem:[#allocation5 + $0x1e0] sm:$0xff]  ;;  %s341_s1 = sshll.u32 %s441_s0, 4  ;;  %s342_s1 = int_to_ptr.vmem [resolvable:$true] %s341_s1 }
   0xd   :  { %v105_v5 = vld [vmem:[#allocation5 + $0x1e8] sm:$0xff]  ;;  %172 = vmatpush.xpose.msra.mxu0 %v74_v2  ;;  %192 = vmatpush.xpose.msra.mxu1 %v75_v3  ;;  %v72_v6 = vld [vmem:[#allocation5 + $0xe0] sm:$0xff]  ;;  %v102_v8 = vld [vmem:[#allocation5 + $0x1d0] sm:$0xff] }
   0xe   :  { %v73_v7 = vld [vmem:[#allocation5 + $0xe8] sm:$0xff]  ;;  %v103_v9 = vld [vmem:[#allocation5 + $0x1d8] sm:$0xff]  ;;  %v70_v10 = vld [vmem:[#allocation5 + $0xd0] sm:$0xff] }
   0xf   :  { %v71_v11 = vld [vmem:[#allocation5 + $0xd8] sm:$0xff]  ;;  %v100_v12 = vld [vmem:[#allocation5 + $0x1c0] sm:$0xff]  ;;  %v101_v13 = vld [vmem:[#allocation5 + $0x1c8] sm:$0xff] }
  0x10   :  { %213 = vmatpush.xpose.msra.mxu2 %v104_v4  ;;  %233 = vmatpush.xpose.msra.mxu3 %v105_v5  ;;  %v68_v14 = vld [vmem:[#allocation5 + $0xc0] sm:$0xff]  ;;  %v69_v15 = vld [vmem:[#allocation5 + $0xc8] sm:$0xff]  ;;  %v98_v16 = vld [vmem:[#allocation5 + $0x1b0] sm:$0xff] }
  0x11   :  { %173 = vmatpush.xpose.msra.mxu0 %v72_v6  ;;  %193 = vmatpush.xpose.msra.mxu1 %v73_v7  ;;  %v99_v17 = vld [vmem:[#allocation5 + $0x1b8] sm:$0xff]  ;;  %v66_v18 = vld [vmem:[#allocation5 + $0xb0] sm:$0xff]  ;;  %v96_v20 = vld [vmem:[#allocation5 + $0x1a0] sm:$0xff] }
  0x12   :  { %v67_v19 = vld [vmem:[#allocation5 + $0xb8] sm:$0xff]  ;;  %v97_v21 = vld [vmem:[#allocation5 + $0x1a8] sm:$0xff]  ;;  %v64_v22 = vld [vmem:[#allocation5 + $0xa0] sm:$0xff] }
  0x13   :  { %v65_v23 = vld [vmem:[#allocation5 + $0xa8] sm:$0xff]  ;;  %v94_v24 = vld [vmem:[#allocation5 + $0x190] sm:$0xff]  ;;  %v95_v25 = vld [vmem:[#allocation5 + $0x198] sm:$0xff] }
  0x14   :  { %214 = vmatpush.xpose.msra.mxu2 %v102_v8  ;;  %234 = vmatpush.xpose.msra.mxu3 %v103_v9  ;;  %v62_v26 = vld [vmem:[#allocation5 + $0x90] sm:$0xff]  ;;  %v63_v27 = vld [vmem:[#allocation5 + $0x98] sm:$0xff]  ;;  %v92_v28 = vld [vmem:[#allocation5 + $0x180] sm:$0xff] }
  0x15   :  { %174 = vmatpush.xpose.msra.mxu0 %v70_v10  ;;  %194 = vmatpush.xpose.msra.mxu1 %v71_v11  ;;  %v93_v29 = vld [vmem:[#allocation5 + $0x188] sm:$0xff]  ;;  %v60_v30 = vld [vmem:[#allocation5 + $0x80] sm:$0xff]  ;;  %v90_v32 = vld [vmem:[#allocation5 + $0x170] sm:$0xff] }
  0x16   :  { %v61_v31 = vld [vmem:[#allocation5 + $0x88] sm:$0xff]  ;;  %v91_v33 = vld [vmem:[#allocation5 + $0x178] sm:$0xff]  ;;  %v58_v34 = vld [vmem:[#allocation5 + $0x70] sm:$0xff] }
  0x17   :  { %v59_v35 = vld [vmem:[#allocation5 + $0x78] sm:$0xff]  ;;  %v88_v36 = vld [vmem:[#allocation5 + $0x160] sm:$0xff]  ;;  %v89_v37 = vld [vmem:[#allocation5 + $0x168] sm:$0xff] }
  0x18   :  { %215 = vmatpush.xpose.msra.mxu2 %v100_v12  ;;  %235 = vmatpush.xpose.msra.mxu3 %v101_v13  ;;  %v56_v38 = vld [vmem:[#allocation5 + $0x60] sm:$0xff]  ;;  %v57_v39 = vld [vmem:[#allocation5 + $0x68] sm:$0xff]  ;;  %v86_v40 = vld [vmem:[#allocation5 + $0x150] sm:$0xff] }
  0x19   :  { %175 = vmatpush.xpose.msra.mxu0 %v68_v14  ;;  %195 = vmatpush.xpose.msra.mxu1 %v69_v15  ;;  %v87_v41 = vld [vmem:[#allocation5 + $0x158] sm:$0xff]  ;;  %v54_v42 = vld [vmem:[#allocation5 + $0x50] sm:$0xff]  ;;  %v84_v44 = vld [vmem:[#allocation5 + $0x140] sm:$0xff] }
  0x1a   :  { %v55_v43 = vld [vmem:[#allocation5 + $0x58] sm:$0xff]  ;;  %v85_v45 = vld [vmem:[#allocation5 + $0x148] sm:$0xff]  ;;  %v52_v46 = vld [vmem:[#allocation5 + $0x40] sm:$0xff] }
  0x1b   :  { %v53_v47 = vld [vmem:[#allocation5 + $0x48] sm:$0xff]  ;;  %v82_v48 = vld [vmem:[#allocation5 + $0x130] sm:$0xff]  ;;  %v83_v49 = vld [vmem:[#allocation5 + $0x138] sm:$0xff] }
  0x1c   :  { %216 = vmatpush.xpose.msra.mxu2 %v98_v16  ;;  %236 = vmatpush.xpose.msra.mxu3 %v99_v17  ;;  %v50_v50 = vld [vmem:[#allocation5 + $0x30] sm:$0xff]  ;;  %v51_v51 = vld [vmem:[#allocation5 + $0x38] sm:$0xff]  ;;  %v80_v52 = vld [vmem:[#allocation5 + $0x120] sm:$0xff] }
  0x1d   :  { %176 = vmatpush.xpose.msra.mxu0 %v66_v18  ;;  %196 = vmatpush.xpose.msra.mxu1 %v67_v19  ;;  %v81_v53 = vld [vmem:[#allocation5 + $0x128] sm:$0xff]  ;;  %v48_v54 = vld [vmem:[#allocation5 + $0x20] sm:$0xff]  ;;  %v78_v56 = vld [vmem:[#allocation5 + $0x110] sm:$0xff] }
  0x1e   :  { %v49_v55 = vld [vmem:[#allocation5 + $0x28] sm:$0xff]  ;;  %v79_v57 = vld [vmem:[#allocation5 + $0x118] sm:$0xff]  ;;  %v46_v58 = vld [vmem:[#allocation5 + $0x10] sm:$0xff] }
  0x1f   :  { %v47_v59 = vld [vmem:[#allocation5 + $0x18] sm:$0xff]  ;;  %v76_v60 = vld [vmem:[#allocation5 + $0x100] sm:$0xff]  ;;  %v77_v61 = vld [vmem:[#allocation5 + $0x108] sm:$0xff] }
  0x20   :  { %217 = vmatpush.xpose.msra.mxu2 %v96_v20  ;;  %237 = vmatpush.xpose.msra.mxu3 %v97_v21  ;;  %v170_v62 = vld [vmem:[#allocation5 + $0x3f0] sm:$0xff]  ;;  %v171_v63 = vld [vmem:[#allocation5 + $0x3f8] sm:$0xff]  ;;  %v44_v0 = vld [vmem:[#allocation5] sm:$0xff] }
  0x21   :  { %177 = vmatpush.xpose.msra.mxu0 %v64_v22  ;;  %197 = vmatpush.xpose.msra.mxu1 %v65_v23  ;;  %v45_v1 = vld [vmem:[#allocation5 + $0x8] sm:$0xff]  ;;  %v138_v2 = vld [vmem:[#allocation5 + $0x2f0] sm:$0xff]  ;;  %v139_v3 = vld [vmem:[#allocation5 + $0x2f8] sm:$0xff] }
  0x22   :  { %v168_v4 = vld [vmem:[#allocation5 + $0x3e0] sm:$0xff]  ;;  %v169_v5 = vld [vmem:[#allocation5 + $0x3e8] sm:$0xff]  ;;  %v166_v8 = vld [vmem:[#allocation5 + $0x3d0] sm:$0xff] }
  0x23   :  { %v136_v6 = vld [vmem:[#allocation5 + $0x2e0] sm:$0xff]  ;;  %v137_v7 = vld [vmem:[#allocation5 + $0x2e8] sm:$0xff]  ;;  %v167_v9 = vld [vmem:[#allocation5 + $0x3d8] sm:$0xff] }
  0x24   :  { %218 = vmatpush.xpose.msra.mxu2 %v94_v24  ;;  %238 = vmatpush.xpose.msra.mxu3 %v95_v25  ;;  %v134_v10 = vld [vmem:[#allocation5 + $0x2d0] sm:$0xff]  ;;  %v135_v11 = vld [vmem:[#allocation5 + $0x2d8] sm:$0xff]  ;;  %v164_v12 = vld [vmem:[#allocation5 + $0x3c0] sm:$0xff] }
  0x25   :  { %178 = vmatpush.xpose.msra.mxu0 %v62_v26  ;;  %198 = vmatpush.xpose.msra.mxu1 %v63_v27  ;;  %v165_v13 = vld [vmem:[#allocation5 + $0x3c8] sm:$0xff]  ;;  %v132_v14 = vld [vmem:[#allocation5 + $0x2c0] sm:$0xff]  ;;  %v162_v16 = vld [vmem:[#allocation5 + $0x3b0] sm:$0xff] }
  0x26   :  { %v133_v15 = vld [vmem:[#allocation5 + $0x2c8] sm:$0xff]  ;;  %v163_v17 = vld [vmem:[#allocation5 + $0x3b8] sm:$0xff]  ;;  %v130_v18 = vld [vmem:[#allocation5 + $0x2b0] sm:$0xff] }
  0x27   :  { %v131_v19 = vld [vmem:[#allocation5 + $0x2b8] sm:$0xff]  ;;  %v160_v20 = vld [vmem:[#allocation5 + $0x3a0] sm:$0xff]  ;;  %v161_v21 = vld [vmem:[#allocation5 + $0x3a8] sm:$0xff] }
  0x28   :  { %219 = vmatpush.xpose.msra.mxu2 %v92_v28  ;;  %239 = vmatpush.xpose.msra.mxu3 %v93_v29  ;;  %v128_v22 = vld [vmem:[#allocation5 + $0x2a0] sm:$0xff]  ;;  %v129_v23 = vld [vmem:[#allocation5 + $0x2a8] sm:$0xff]  ;;  %v463_v24 = vld [vmem:[#allocation2] sm:$0xff] }
  0x29   :  { %179 = vmatpush.xpose.msra.mxu0 %v60_v30  ;;  %199 = vmatpush.xpose.msra.mxu1 %v61_v31  ;;  %v158_v25 = vld [vmem:[#allocation5 + $0x390] sm:$0xff]  ;;  %v159_v26 = vld [vmem:[#allocation5 + $0x398] sm:$0xff]  ;;  %v156_v30 = vld [vmem:[#allocation5 + $0x380] sm:$0xff] }
  0x2a   :  { %v466_v27 = vld [vmem:[#allocation2 + $0x8] sm:$0xff]  ;;  %v126_v28 = vld [vmem:[#allocation5 + $0x290] sm:$0xff]  ;;  %v157_v31 = vld [vmem:[#allocation5 + $0x388] sm:$0xff] }
  0x2b   :  { %v127_v29 = vld [vmem:[#allocation5 + $0x298] sm:$0xff] }
  0x2c   :  { %220 = vmatpush.xpose.msra.mxu2 %v90_v32  ;;  %240 = vmatpush.xpose.msra.mxu3 %v91_v33  ;;  %v124_v32 = vld [vmem:[#allocation5 + $0x280] sm:$0xff]  ;;  %v125_v33 = vld [vmem:[#allocation5 + $0x288] sm:$0xff] }
  0x2d   :  { %180 = vmatpush.xpose.msra.mxu0 %v58_v34  ;;  %200 = vmatpush.xpose.msra.mxu1 %v59_v35  ;;  %v154_v34 = vld [vmem:[#allocation5 + $0x370] sm:$0xff]  ;;  %v155_v35 = vld [vmem:[#allocation5 + $0x378] sm:$0xff] }
  0x30   :  { %221 = vmatpush.xpose.msra.mxu2 %v88_v36  ;;  %241 = vmatpush.xpose.msra.mxu3 %v89_v37  ;;  %v122_v36 = vld [vmem:[#allocation5 + $0x270] sm:$0xff]  ;;  %v123_v37 = vld [vmem:[#allocation5 + $0x278] sm:$0xff] }
  0x31   :  { %181 = vmatpush.xpose.msra.mxu0 %v56_v38  ;;  %201 = vmatpush.xpose.msra.mxu1 %v57_v39  ;;  %v152_v38 = vld [vmem:[#allocation5 + $0x360] sm:$0xff]  ;;  %v153_v39 = vld [vmem:[#allocation5 + $0x368] sm:$0xff] }
  0x34   :  { %222 = vmatpush.xpose.msra.mxu2 %v86_v40  ;;  %242 = vmatpush.xpose.msra.mxu3 %v87_v41  ;;  %v120_v40 = vld [vmem:[#allocation5 + $0x260] sm:$0xff]  ;;  %v121_v41 = vld [vmem:[#allocation5 + $0x268] sm:$0xff] }
  0x35   :  { %182 = vmatpush.xpose.msra.mxu0 %v54_v42  ;;  %202 = vmatpush.xpose.msra.mxu1 %v55_v43  ;;  %v150_v42 = vld [vmem:[#allocation5 + $0x350] sm:$0xff]  ;;  %v151_v43 = vld [vmem:[#allocation5 + $0x358] sm:$0xff] }
  0x38   :  { %223 = vmatpush.xpose.msra.mxu2 %v84_v44  ;;  %243 = vmatpush.xpose.msra.mxu3 %v85_v45  ;;  %v118_v44 = vld [vmem:[#allocation5 + $0x250] sm:$0xff]  ;;  %v119_v45 = vld [vmem:[#allocation5 + $0x258] sm:$0xff] }
  0x39   :  { %183 = vmatpush.xpose.msra.mxu0 %v52_v46  ;;  %203 = vmatpush.xpose.msra.mxu1 %v53_v47  ;;  %v148_v46 = vld [vmem:[#allocation5 + $0x340] sm:$0xff]  ;;  %v149_v47 = vld [vmem:[#allocation5 + $0x348] sm:$0xff] }
  0x3c   :  { %224 = vmatpush.xpose.msra.mxu2 %v82_v48  ;;  %244 = vmatpush.xpose.msra.mxu3 %v83_v49  ;;  %v116_v48 = vld [vmem:[#allocation5 + $0x240] sm:$0xff]  ;;  %v117_v49 = vld [vmem:[#allocation5 + $0x248] sm:$0xff] }
  0x3d   :  { %184 = vmatpush.xpose.msra.mxu0 %v50_v50  ;;  %204 = vmatpush.xpose.msra.mxu1 %v51_v51  ;;  %v146_v50 = vld [vmem:[#allocation5 + $0x330] sm:$0xff]  ;;  %v147_v51 = vld [vmem:[#allocation5 + $0x338] sm:$0xff] }
  0x40   :  { %225 = vmatpush.xpose.msra.mxu2 %v80_v52  ;;  %245 = vmatpush.xpose.msra.mxu3 %v81_v53  ;;  %v114_v52 = vld [vmem:[#allocation5 + $0x230] sm:$0xff]  ;;  %v115_v53 = vld [vmem:[#allocation5 + $0x238] sm:$0xff] }
  0x41   :  { %185 = vmatpush.xpose.msra.mxu0 %v48_v54  ;;  %205 = vmatpush.xpose.msra.mxu1 %v49_v55  ;;  %v144_v54 = vld [vmem:[#allocation5 + $0x320] sm:$0xff]  ;;  %v145_v55 = vld [vmem:[#allocation5 + $0x328] sm:$0xff] }
  0x44   :  { %226 = vmatpush.xpose.msra.mxu2 %v78_v56  ;;  %246 = vmatpush.xpose.msra.mxu3 %v79_v57  ;;  %v112_v56 = vld [vmem:[#allocation5 + $0x220] sm:$0xff]  ;;  %v113_v57 = vld [vmem:[#allocation5 + $0x228] sm:$0xff] }
  0x45   :  { %186 = vmatpush.xpose.msra.mxu0 %v46_v58  ;;  %206 = vmatpush.xpose.msra.mxu1 %v47_v59  ;;  %v142_v58 = vld [vmem:[#allocation5 + $0x310] sm:$0xff]  ;;  %v143_v59 = vld [vmem:[#allocation5 + $0x318] sm:$0xff] }
  0x48   :  { %227 = vmatpush.xpose.msra.mxu2 %v76_v60  ;;  %247 = vmatpush.xpose.msra.mxu3 %v77_v61  ;;  %v110_v60 = vld [vmem:[#allocation5 + $0x210] sm:$0xff]  ;;  %v111_v61 = vld [vmem:[#allocation5 + $0x218] sm:$0xff] }
  0x49   :  { %187 = vmatpush.xpose.msra.mxu0 %v44_v0  ;;  %207 = vmatpush.xpose.msra.mxu1 %v45_v1  ;;  %v108_v0 = vld [vmem:[#allocation5 + $0x200] sm:$0xff]  ;;  %v109_v1 = vld [vmem:[#allocation5 + $0x208] sm:$0xff] }
  0x4b   :  { %228 = vmatmul.f32.vlgmr.msra.gmra.mxu2 %v463_v24  ;;  %248 = vmatmul.f32.vlgmr.msra.gmra.mxu3 %v466_v27 }
  0x4c   :  { %292 = vmatpush.xpose.msrb.mxu2 %v170_v62  ;;  %312 = vmatpush.xpose.msrb.mxu3 %v171_v63  ;;  %v140_v62 = vld [vmem:[#allocation5 + $0x300] sm:$0xff]  ;;  %v141_v63 = vld [vmem:[#allocation5 + $0x308] sm:$0xff] }
  0x4d   :  { %252 = vmatpush.xpose.msrb.mxu0 %v138_v2  ;;  %272 = vmatpush.xpose.msrb.mxu1 %v139_v3 }
  0x4e   :  { %188 = vmatmul.f32.vlgmr.msra.gmra.mxu0 %v463_v24  ;;  %208 = vmatmul.f32.vlgmr.msra.gmra.mxu1 %v466_v27 }
  0x50   :  { %293 = vmatpush.xpose.msrb.mxu2 %v168_v4  ;;  %313 = vmatpush.xpose.msrb.mxu3 %v169_v5 }
  0x51   :  { %253 = vmatpush.xpose.msrb.mxu0 %v136_v6  ;;  %273 = vmatpush.xpose.msrb.mxu1 %v137_v7 }
  0x54   :  { %294 = vmatpush.xpose.msrb.mxu2 %v166_v8  ;;  %314 = vmatpush.xpose.msrb.mxu3 %v167_v9 }
  0x55   :  { %254 = vmatpush.xpose.msrb.mxu0 %v134_v10  ;;  %274 = vmatpush.xpose.msrb.mxu1 %v135_v11 }
  0x58   :  { %295 = vmatpush.xpose.msrb.mxu2 %v164_v12  ;;  %315 = vmatpush.xpose.msrb.mxu3 %v165_v13 }
  0x59   :  { %255 = vmatpush.xpose.msrb.mxu0 %v132_v14  ;;  %275 = vmatpush.xpose.msrb.mxu1 %v133_v15 }
  0x5c   :  { %296 = vmatpush.xpose.msrb.mxu2 %v162_v16  ;;  %316 = vmatpush.xpose.msrb.mxu3 %v163_v17 }
  0x5d   :  { %256 = vmatpush.xpose.msrb.mxu0 %v130_v18  ;;  %276 = vmatpush.xpose.msrb.mxu1 %v131_v19 }
  0x60   :  { %297 = vmatpush.xpose.msrb.mxu2 %v160_v20  ;;  %317 = vmatpush.xpose.msrb.mxu3 %v161_v21 }
  0x61   :  { %257 = vmatpush.xpose.msrb.mxu0 %v128_v22  ;;  %277 = vmatpush.xpose.msrb.mxu1 %v129_v23 }
  0x64   :  { %298 = vmatpush.xpose.msrb.mxu2 %v158_v25  ;;  %318 = vmatpush.xpose.msrb.mxu3 %v159_v26 }
  0x65   :  { %258 = vmatpush.xpose.msrb.mxu0 %v126_v28  ;;  %278 = vmatpush.xpose.msrb.mxu1 %v127_v29 }
  0x68   :  { %299 = vmatpush.xpose.msrb.mxu2 %v156_v30  ;;  %319 = vmatpush.xpose.msrb.mxu3 %v157_v31 }
  0x69   :  { %259 = vmatpush.xpose.msrb.mxu0 %v124_v32  ;;  %279 = vmatpush.xpose.msrb.mxu1 %v125_v33 }
  0x6c   :  { %300 = vmatpush.xpose.msrb.mxu2 %v154_v34  ;;  %320 = vmatpush.xpose.msrb.mxu3 %v155_v35 }
  0x6d   :  { %260 = vmatpush.xpose.msrb.mxu0 %v122_v36  ;;  %280 = vmatpush.xpose.msrb.mxu1 %v123_v37 }
  0x70   :  { %301 = vmatpush.xpose.msrb.mxu2 %v152_v38  ;;  %321 = vmatpush.xpose.msrb.mxu3 %v153_v39 }
  0x71   :  { %261 = vmatpush.xpose.msrb.mxu0 %v120_v40  ;;  %281 = vmatpush.xpose.msrb.mxu1 %v121_v41 }
  0x74   :  { %302 = vmatpush.xpose.msrb.mxu2 %v150_v42  ;;  %322 = vmatpush.xpose.msrb.mxu3 %v151_v43 }
  0x75   :  { %262 = vmatpush.xpose.msrb.mxu0 %v118_v44  ;;  %282 = vmatpush.xpose.msrb.mxu1 %v119_v45 }
  0x78   :  { %303 = vmatpush.xpose.msrb.mxu2 %v148_v46  ;;  %323 = vmatpush.xpose.msrb.mxu3 %v149_v47 }
  0x79   :  { %263 = vmatpush.xpose.msrb.mxu0 %v116_v48  ;;  %283 = vmatpush.xpose.msrb.mxu1 %v117_v49 }
  0x7c   :  { %304 = vmatpush.xpose.msrb.mxu2 %v146_v50  ;;  %324 = vmatpush.xpose.msrb.mxu3 %v147_v51 }
  0x7d   :  { %264 = vmatpush.xpose.msrb.mxu0 %v114_v52  ;;  %284 = vmatpush.xpose.msrb.mxu1 %v115_v53 }
  0x80   :  { %305 = vmatpush.xpose.msrb.mxu2 %v144_v54  ;;  %325 = vmatpush.xpose.msrb.mxu3 %v145_v55 }
  0x81   :  { %265 = vmatpush.xpose.msrb.mxu0 %v112_v56  ;;  %285 = vmatpush.xpose.msrb.mxu1 %v113_v57 }
  0x84   :  { %306 = vmatpush.xpose.msrb.mxu2 %v142_v58  ;;  %326 = vmatpush.xpose.msrb.mxu3 %v143_v59 }
  0x85   :  { %266 = vmatpush.xpose.msrb.mxu0 %v110_v60  ;;  %286 = vmatpush.xpose.msrb.mxu1 %v111_v61 }
  0x88   :  { %307 = vmatpush.xpose.msrb.mxu2 %v140_v62  ;;  %327 = vmatpush.xpose.msrb.mxu3 %v141_v63 }
  0x89   :  { %267 = vmatpush.xpose.msrb.mxu0 %v108_v0  ;;  %287 = vmatpush.xpose.msrb.mxu1 %v109_v1 }
  0x8b   :  { %308 = vmatmul.f32.vlgmr.msrb.gmra.mxu2 %v463_v24  ;;  %328 = vmatmul.f32.vlgmr.msrb.gmra.mxu3 %v466_v27 }
  0x8c   :  { %268 = vmatmul.f32.vlgmr.msrb.gmra.mxu0 %v463_v24  ;;  %288 = vmatmul.f32.vlgmr.msrb.gmra.mxu1 %v466_v27 }
  0xcb   :  { %v189_v2 = vpop.f32.mrf.mxu0  ;;  %v209_v3 = vpop.f32.mrf.mxu1 }
  0xcc   :  { %v210_v4 = vadd.f32 %v209_v3, %v189_v2 }
  0xce   :  { %332 = vst [vmem:[#allocation7] sm:$0xff] %v210_v4  ;;  %v229_v5 = vpop.f32.mrf.mxu2  ;;  %v249_v6 = vpop.f32.mrf.mxu3 }
  0xcf   :  { %v250_v7 = vadd.f32 %v249_v6, %v229_v5 }
  0xd1   :  { %333 = vst [vmem:[#allocation7 + $0x8] sm:$0xff] %v250_v7 }
 0x109   :  { %v269_v8 = vpop.f32.mrf.mxu0  ;;  %v289_v9 = vpop.f32.mrf.mxu1 }
 0x10a   :  { %v290_v10 = vadd.f32 %v289_v9, %v269_v8 }
 0x10c   :  { %334 = vst [vmem:[#allocation7 + $0x10] sm:$0xff] %v290_v10 }
 0x10e   :  { %v309_v11 = vpop.f32.mrf.mxu2  ;;  %v329_v12 = vpop.f32.mrf.mxu3 }
 0x10f   :  { %v330_v13 = vadd.f32 %v329_v12, %v309_v11 }
 0x111   :  { %335 = vst [vmem:[#allocation7 + $0x18] sm:$0xff] %v330_v13 }
 0x112   :  { %346 = dma.vmem_to_hbm [thread:$0]  %s342_s1, 512, %s344_s23, [#allocation4]  }
 0x113   :  { %435 = dma.done.wait [#allocation4], 512  }
 0x114   :  { %436 = vsyncadd [#allocation4], 4294966784 }
 0x115   :  { %351 = vsyncpa [#allocation3], 1 }
 0x116   :  { %352 = vsyncpa [#allocation6], 1 }
 0x117   :  { %353 = vsyncpa [#allocation4], 1 }

</bundles_post_ra>
